<compile_context>
chip_gen: v7x
topology: tpu7x:2x2x1
jax: 0.10.0
libtpu: 0.0.40
codegen_flags: <defaults>
</compile_context>

<pallas_src>
import jax
import jax.numpy as jnp
from jax.experimental import pallas as pl
from jax.experimental.pallas import tpu as pltpu

_COMPUTE_DTYPE = jnp.bfloat16  # MXU operands; accumulation stays f32.


def _round_up(x: int, m: int) -> int:
    return ((x + m - 1) // m) * m


def mlp_kernel(x_ref, w1_ref, b1_ref, w2_ref, b2_ref, o_ref, h_ref, acc_ref):
    """One (i, j, k) grid step.

    i: batch tile ("parallel"), j: output-feature tile, k: hidden chunk
    (both "arbitrary", k innermost).  h is computed only at j == 0 per batch
    tile and cached in a bf16 VMEM scratch indexed by k; the second matmul
    accumulates over k into an f32 scratch and is finalized at the last k.
    """
    j = pl.program_id(1)
    k = pl.program_id(2)
    nk = pl.num_programs(2)

    @pl.when(k == 0)
    def _():
        acc_ref[...] = jnp.zeros_like(acc_ref)

    # Layer 1 (x @ W1 + b1, ReLU) only on the first output-tile pass.
    @pl.when(j == 0)
    def _():
        h = jnp.dot(x_ref[...], w1_ref[...],
                    preferred_element_type=jnp.float32)
        h = jnp.maximum(h + b1_ref[...], 0.0)
        h_ref[k] = h.astype(h_ref.dtype)  # bf16 hidden chunk (TM, TD2)

    # Layer 2 partial product for this hidden chunk (f32 accumulation).
    acc_ref[...] += jnp.dot(h_ref[k], w2_ref[...],
                            preferred_element_type=jnp.float32)

    @pl.when(k == nk - 1)
    def _():
        o_ref[...] = (acc_ref[...] + b2_ref[...]).astype(o_ref.dtype)


def prepare_params(w1, b1, w2, b2, *, tn=None, td2=None):
    """Pad + cast parameters once (call OUTSIDE the per-step hot path).

    w1: [d1, d2], b1: [1, d2] or [d2], w2: [d2, K], b2: [1, K] or [K].
    """
    d1, d2 = w1.shape
    K = w2.shape[1]
    b1 = jnp.reshape(b1, (1, d2))
    b2 = jnp.reshape(b2, (1, K))

    d1p = _round_up(d1, 128)
    d2p = _round_up(d2, 128)
    TD2 = td2 if td2 is not None else min(512, d2p)      # hidden chunk width
    d2p = _round_up(d2p, TD2)
    kp = _round_up(K, 128)
    TN = tn if tn is not None else min(512, _round_up(kp, 256))  # 256-aligned
    Kp = _round_up(kp, TN)

    w1p = jnp.zeros((d1p, d2p), _COMPUTE_DTYPE).at[:d1, :d2].set(
        w1.astype(_COMPUTE_DTYPE))
    b1p = jnp.zeros((1, d2p), jnp.float32).at[:, :d2].set(
        b1.astype(jnp.float32))
    w2p = jnp.zeros((d2p, Kp), _COMPUTE_DTYPE).at[:d2, :K].set(
        w2.astype(_COMPUTE_DTYPE))
    b2p = jnp.zeros((1, Kp), jnp.float32).at[:, :K].set(
        b2.astype(jnp.float32))
    return dict(w1=w1p, b1=b1p, w2=w2p, b2=b2p,
                dims=(d1, d2, K), tiles=(TD2, TN))


def mlp_forward(x, params, *, tm=None):
    """x: [B, d1] -> [B, K], matching nn.Linear(d1,d2) -> ReLU -> nn.Linear(d2,K)."""
    d1, d2, K = params["dims"]
    TD2, TN = params["tiles"]
    w1p, b1p, w2p, b2p = params["w1"], params["b1"], params["w2"], params["b2"]
    d1p, d2p = w1p.shape
    Kp = w2p.shape[1]
    nk = d2p // TD2

    B = x.shape[0]
    out_dtype = x.dtype

    # TM >= 16 (bf16 sublane packing), up to 256 (fills 256x256 MXU on v6e/v7x).
    TM = tm if tm is not None else max(16, min(256, _round_up(B, 16)))
    Bp = _round_up(B, TM)

    # Pad / cast the activation only when actually misaligned.
    if B == Bp and d1 == d1p and x.dtype == _COMPUTE_DTYPE:
        xp = x
    else:
        xp = jnp.zeros((Bp, d1p), _COMPUTE_DTYPE).at[:B, :d1].set(
            x.astype(_COMPUTE_DTYPE))

    grid = (Bp // TM, Kp // TN, nk)

    # W1 / b1 are only consumed at j == 0; clamp their block index for j > 0 so
    # Pallas does not re-stream them from HBM on every output-tile pass.
    def w1_like_map(i, j, k, _last=nk - 1):
        return (0, jnp.where(j == 0, k, _last))

    # Size the scoped VMEM limit from the actual block footprint
    # (inputs/outputs double-buffered, scratch single-buffered), capped so it
    # also stays inside v7x's 64 MiB physical VMEM.
    out_bytes = jnp.dtype(out_dtype).itemsize
    vmem_est = (
        2 * TM * d1p * 2            # x tile (bf16)
        + 2 * d1p * TD2 * 2         # W1 chunk (bf16)
        + 2 * TD2 * 4               # b1 chunk (f32)
        + 2 * TD2 * TN * 2          # W2 chunk (bf16)
        + 2 * TN * 4                # b2 chunk (f32)
        + 2 * TM * TN * out_bytes   # output tile
        + nk * TM * TD2 * 2         # hidden scratch (bf16)
        + TM * TN * 4               # layer-2 accumulator (f32)
    )
    vmem_limit = min(64 * 1024 * 1024,
                     max(32 * 1024 * 1024, int(vmem_est * 1.3)))

    out = pl.pallas_call(
        mlp_kernel,
        out_shape=jax.ShapeDtypeStruct((Bp, Kp), out_dtype),
        grid_spec=pltpu.PrefetchScalarGridSpec(
            num_scalar_prefetch=0,
            grid=grid,
            in_specs=[
                pl.BlockSpec((TM, d1p), lambda i, j, k: (i, 0)),   # x tile
                pl.BlockSpec((d1p, TD2), w1_like_map),             # W1 chunk
                pl.BlockSpec((1, TD2), w1_like_map),               # b1 chunk
                pl.BlockSpec((TD2, TN), lambda i, j, k: (k, j)),   # W2 chunk
                pl.BlockSpec((1, TN), lambda i, j, k: (0, j)),     # b2 tile
            ],
            out_specs=pl.BlockSpec((TM, TN), lambda i, j, k: (i, j)),
            scratch_shapes=[
                pltpu.VMEM((nk, TM, TD2), _COMPUTE_DTYPE),  # cached hidden act
                pltpu.VMEM((TM, TN), jnp.float32),           # layer-2 accum
            ],
        ),
        compiler_params=pltpu.CompilerParams(
            dimension_semantics=("parallel", "arbitrary", "arbitrary"),
            vmem_limit_bytes=vmem_limit,
        ),
    )(xp, w1p, b1p, w2p, b2p)

    # Output is already in out_dtype; just strip the padding.
    return out[:B, :K]


def init_params(key, d1, d2, K, dtype=jnp.float32):
    """Deterministic init mimicking nn.Linear default (U[-1/sqrt(fan_in), +])."""
    k1, k2, k3, k4 = jax.random.split(key, 4)
    bound1 = 1.0 / (d1 ** 0.5)
    bound2 = 1.0 / (d2 ** 0.5)
    w1 = jax.random.uniform(k1, (d1, d2), dtype, -bound1, bound1)
    b1 = jax.random.uniform(k2, (1, d2), dtype, -bound1, bound1)
    w2 = jax.random.uniform(k3, (d2, K), dtype, -bound2, bound2)
    b2 = jax.random.uniform(k4, (1, K), dtype, -bound2, bound2)
    return w1, b1, w2, b2


def _reference(x, w1, b1, w2, b2):
    # Matches the kernel's bf16-operand / f32-accumulate numerics.
    # TODO(synk): results are bf16-MXU precision, not bit-identical to f32 PyTorch.
    bf = jnp.bfloat16
    h = jnp.maximum(
        jnp.dot(x.astype(bf), w1.astype(bf),
                preferred_element_type=jnp.float32) + b1.astype(jnp.float32),
        0.0)
    out = jnp.dot(h.astype(bf), w2.astype(bf),
                  preferred_element_type=jnp.float32) + b2.astype(jnp.float32)
    return out.astype(x.dtype)


if __name__ == "__main__":
    key = jax.random.PRNGKey(0)
    kx, kw, kx2, kw2 = jax.random.split(key, 4)

    # Small shapes consistent with MLP(d1, d2, K).forward(x [B, d1]).
    B, d1, d2, K = 8, 32, 64, 16
    x = jax.random.normal(kx, (B, d1), jnp.float32)
    w1, b1, w2, b2 = init_params(kw, d1, d2, K)
    params = prepare_params(w1, b1, w2, b2)
    out = jax.block_until_ready(mlp_forward(x, params))
    assert out.shape == (B, K) and out.dtype == x.dtype
    ref = _reference(x, w1, b1, w2, b2)
    assert jnp.allclose(out, ref, atol=1e-2, rtol=1e-2), (
        float(jnp.max(jnp.abs(out - ref))))

    # Multi-tile configuration exercising the full (i, j, k) grid: hidden-scratch
    # reuse across j and accumulation across hidden chunks k.
    B2, d1_2, d2_2, K2 = 40, 96, 300, 600
    x2 = jax.random.normal(kx2, (B2, d1_2), jnp.float32)
    w1_2, b1_2, w2_2, b2_2 = init_params(kw2, d1_2, d2_2, K2)
    params2 = prepare_params(w1_2, b1_2, w2_2, b2_2, tn=256, td2=128)
    out2 = jax.block_until_ready(mlp_forward(x2, params2, tm=16))
    assert out2.shape == (B2, K2) and out2.dtype == x2.dtype
    ref2 = _reference(x2, w1_2, b1_2, w2_2, b2_2)
    assert jnp.allclose(out2, ref2, atol=5e-2, rtol=5e-2), (
        float(jnp.max(jnp.abs(out2 - ref2))))

    print("KERNEL_OK")
</pallas_src>

<mosaic_0001>
module attributes {stable_mosaic.version = 11 : i64} {
  func.func @mlp_kernel(%arg0: i32, %arg1: i32, %arg2: i32, %arg3: memref<16x128xbf16, #tpu.memory_space<vmem>>, %arg4: memref<128x128xbf16, #tpu.memory_space<vmem>>, %arg5: memref<1x128xf32, #tpu.memory_space<vmem>>, %arg6: memref<128x256xbf16, #tpu.memory_space<vmem>>, %arg7: memref<1x256xf32, #tpu.memory_space<vmem>>, %arg8: memref<16x256xf32, #tpu.memory_space<vmem>>, %arg9: memref<1x16x128xbf16, #tpu.memory_space<vmem>>, %arg10: memref<16x256xf32, #tpu.memory_space<vmem>>) attributes {dimension_semantics = [#tpu.dimension_semantics<parallel>, #tpu.dimension_semantics<arbitrary>, #tpu.dimension_semantics<arbitrary>], iteration_bounds = array<i64: 1, 1, 1>, scalar_prefetch = 0 : i64, scratch_operands = 2 : i64, tpu.core_type = #tpu.core_type<tc>, window_params = [{transform_indices = @transform_0, window_bounds = array<i64: 16, 128>}, {transform_indices = @transform_1, window_bounds = array<i64: 128, 128>}, {transform_indices = @transform_2, window_bounds = array<i64: 1, 128>}, {transform_indices = @transform_3, window_bounds = array<i64: 128, 256>}, {transform_indices = @transform_4, window_bounds = array<i64: 1, 256>}, {transform_indices = @transform_5, window_bounds = array<i64: 16, 256>}]} {
    %c0_i32 = arith.constant 0 : i32
    %0 = arith.cmpi eq, %arg2, %c0_i32 : i32
    %1 = arith.extui %0 : i1 to i32
    %c0_i32_0 = arith.constant 0 : i32
    %2 = arith.cmpi ne, %1, %c0_i32_0 : i32
    scf.if %2 {
      %cst_12 = arith.constant 0.000000e+00 : f32
      %17 = vector.broadcast %cst_12 : f32 to vector<16x256xf32>
      %c0_13 = arith.constant 0 : index
      %c0_14 = arith.constant 0 : index
      %18 = vector.load %arg10[%c0_13, %c0_14] : memref<16x256xf32, #tpu.memory_space<vmem>>, vector<16x256xf32>
      tpu.vector_store %arg10[%c0_13, %c0_14], %17 {strides = array<i32>} : memref<16x256xf32, #tpu.memory_space<vmem>>, vector<16x256xf32>,
    } else {
    }
    %c0_i32_1 = arith.constant 0 : i32
    %3 = arith.cmpi eq, %arg1, %c0_i32_1 : i32
    %4 = arith.extui %3 : i1 to i32
    %c0_i32_2 = arith.constant 0 : i32
    %5 = arith.cmpi ne, %4, %c0_i32_2 : i32
    scf.if %5 {
      %c0_12 = arith.constant 0 : index
      %c0_13 = arith.constant 0 : index
      %17 = vector.load %arg3[%c0_12, %c0_13] : memref<16x128xbf16, #tpu.memory_space<vmem>>, vector<16x128xbf16>
      %c0_14 = arith.constant 0 : index
      %c0_15 = arith.constant 0 : index
      %18 = vector.load %arg4[%c0_14, %c0_15] : memref<128x128xbf16, #tpu.memory_space<vmem>>, vector<128x128xbf16>
      %cst_16 = arith.constant dense<0.000000e+00> : vector<16x128xf32>
      %19 = tpu.matmul %17, %18, %cst_16 {dimension_numbers = #tpu.dot_dimension_numbers<[1], [0], [0], [1], [0, 0, 1, 1], [], []>} : vector<16x128xbf16>, vector<128x128xbf16>, vector<16x128xf32> -> vector<16x128xf32>
      %c0_17 = arith.constant 0 : index
      %c0_18 = arith.constant 0 : index
      %20 = vector.load %arg5[%c0_17, %c0_18] : memref<1x128xf32, #tpu.memory_space<vmem>>, vector<1x128xf32>
      %21 = vector.broadcast %20 : vector<1x128xf32> to vector<16x128xf32>
      %22 = arith.addf %19, %21 : vector<16x128xf32>
      %cst_19 = arith.constant 0.000000e+00 : f32
      %23 = vector.broadcast %cst_19 : f32 to vector<16x128xf32>
      %24 = arith.maximumf %22, %23 : vector<16x128xf32>
      %25 = arith.truncf %24 : vector<16x128xf32> to vector<16x128xbf16>
      %26 = arith.index_cast %arg2 : i32 to index
      %c0_20 = arith.constant 0 : index
      %c0_21 = arith.constant 0 : index
      %27 = vector.load %arg9[%26, %c0_20, %c0_21] : memref<1x16x128xbf16, #tpu.memory_space<vmem>>, vector<1x16x128xbf16>
      %28 = vector.shape_cast %27 : vector<1x16x128xbf16> to vector<16x128xbf16>
      %29 = vector.shape_cast %25 : vector<16x128xbf16> to vector<1x16x128xbf16>
      tpu.vector_store %arg9[%26, %c0_20, %c0_21], %29 {strides = array<i32>} : memref<1x16x128xbf16, #tpu.memory_space<vmem>>, vector<1x16x128xbf16>,
    } else {
    }
    %c0 = arith.constant 0 : index
    %c0_3 = arith.constant 0 : index
    %6 = vector.load %arg10[%c0, %c0_3] : memref<16x256xf32, #tpu.memory_space<vmem>>, vector<16x256xf32>
    %7 = arith.index_cast %arg2 : i32 to index
    %c0_4 = arith.constant 0 : index
    %c0_5 = arith.constant 0 : index
    %8 = vector.load %arg9[%7, %c0_4, %c0_5] : memref<1x16x128xbf16, #tpu.memory_space<vmem>>, vector<1x16x128xbf16>
    %9 = vector.shape_cast %8 : vector<1x16x128xbf16> to vector<16x128xbf16>
    %c0_6 = arith.constant 0 : index
    %c0_7 = arith.constant 0 : index
    %10 = vector.load %arg6[%c0_6, %c0_7] : memref<128x256xbf16, #tpu.memory_space<vmem>>, vector<128x256xbf16>
    %cst = arith.constant dense<0.000000e+00> : vector<16x256xf32>
    %11 = tpu.matmul %9, %10, %cst {dimension_numbers = #tpu.dot_dimension_numbers<[1], [0], [0], [1], [0, 0, 1, 1], [], []>} : vector<16x128xbf16>, vector<128x256xbf16>, vector<16x256xf32> -> vector<16x256xf32>
    %12 = arith.addf %6, %11 : vector<16x256xf32>
    %c0_8 = arith.constant 0 : index
    %c0_9 = arith.constant 0 : index
    %13 = vector.load %arg10[%c0_8, %c0_9] : memref<16x256xf32, #tpu.memory_space<vmem>>, vector<16x256xf32>
    tpu.vector_store %arg10[%c0_8, %c0_9], %12 {strides = array<i32>} : memref<16x256xf32, #tpu.memory_space<vmem>>, vector<16x256xf32>,
    %c0_i32_10 = arith.constant 0 : i32
    %14 = arith.cmpi eq, %arg2, %c0_i32_10 : i32
    %15 = arith.extui %14 : i1 to i32
    %c0_i32_11 = arith.constant 0 : i32
    %16 = arith.cmpi ne, %15, %c0_i32_11 : i32
    scf.if %16 {
      %c0_12 = arith.constant 0 : index
      %c0_13 = arith.constant 0 : index
      %17 = vector.load %arg10[%c0_12, %c0_13] : memref<16x256xf32, #tpu.memory_space<vmem>>, vector<16x256xf32>
      %c0_14 = arith.constant 0 : index
      %c0_15 = arith.constant 0 : index
      %18 = vector.load %arg7[%c0_14, %c0_15] : memref<1x256xf32, #tpu.memory_space<vmem>>, vector<1x256xf32>
      %19 = vector.broadcast %18 : vector<1x256xf32> to vector<16x256xf32>
      %20 = arith.addf %17, %19 : vector<16x256xf32>
      %c0_16 = arith.constant 0 : index
      %c0_17 = arith.constant 0 : index
      %21 = vector.load %arg8[%c0_16, %c0_17] : memref<16x256xf32, #tpu.memory_space<vmem>>, vector<16x256xf32>
      tpu.vector_store %arg8[%c0_16, %c0_17], %20 {strides = array<i32>} : memref<16x256xf32, #tpu.memory_space<vmem>>, vector<16x256xf32>,
    } else {
    }
    return
  }
  func.func @transform_0(%arg0: i32, %arg1: i32, %arg2: i32) -> (i32, i32) {
    %c0_i32 = arith.constant 0 : i32
    %c0_i32_0 = arith.constant 0 : i32
    return %arg0, %c0_i32 : i32, i32
  }
  func.func @transform_1(%arg0: i32, %arg1: i32, %arg2: i32) -> (i32, i32) {
    %c0_i32 = arith.constant 0 : i32
    %0 = arith.cmpi eq, %arg1, %c0_i32 : i32
    %c0_i32_0 = arith.constant 0 : i32
    %1 = arith.select %0, %arg2, %c0_i32_0 : i32
    %c0_i32_1 = arith.constant 0 : i32
    %c0_i32_2 = arith.constant 0 : i32
    return %c0_i32_1, %1 : i32, i32
  }
  func.func @transform_2(%arg0: i32, %arg1: i32, %arg2: i32) -> (i32, i32) {
    %c0_i32 = arith.constant 0 : i32
    %0 = arith.cmpi eq, %arg1, %c0_i32 : i32
    %c0_i32_0 = arith.constant 0 : i32
    %1 = arith.select %0, %arg2, %c0_i32_0 : i32
    %c0_i32_1 = arith.constant 0 : i32
    %c0_i32_2 = arith.constant 0 : i32
    return %c0_i32_1, %1 : i32, i32
  }
  func.func @transform_3(%arg0: i32, %arg1: i32, %arg2: i32) -> (i32, i32) {
    %c0_i32 = arith.constant 0 : i32
    return %arg2, %arg1 : i32, i32
  }
  func.func @transform_4(%arg0: i32, %arg1: i32, %arg2: i32) -> (i32, i32) {
    %c0_i32 = arith.constant 0 : i32
    %c0_i32_0 = arith.constant 0 : i32
    return %c0_i32, %arg1 : i32, i32
  }
  func.func @transform_5(%arg0: i32, %arg1: i32, %arg2: i32) -> (i32, i32) {
    %c0_i32 = arith.constant 0 : i32
    return %arg0, %arg1 : i32, i32
  }
}

</mosaic_0001>

<bundles_post_ra>
// kernel: tpu_custom_call.1
= control target key start
LH: loop header
LB: loop body
LE: loop exit
PB: predicated region body
PF: predicated region fallthrough
CT: control target
= control target key end

     0   :  { %10 = vsyncpa [#allocation5], 0  ;;  %s725_s0 = inlined_call_operand.hbm [shape: bf16[16,128], index: 0, kind: input, shape index: {}]   ;;  %s726_s1 = inlined_call_operand.hbm [shape: bf16[128,128], index: 1, kind: input, shape index: {}]   ;;  %s727_s2 = inlined_call_operand.vmem [shape: f32[1,128], index: 2, kind: input, shape index: {}]   ;;  %s728_s3 = inlined_call_operand.hbm [shape: bf16[128,256], index: 3, kind: input, shape index: {}]   ;;  %s729_s4 = inlined_call_operand.vmem [shape: f32[1,256], index: 4, kind: input, shape index: {}]   ;;  %s730_s5 = inlined_call_operand.hbm [shape: f32[16,256], index: 5, kind: output, shape index: {}]  }
   0x1   :  { %11 = vsyncpa [#allocation8], 0 }
   0x2   :  { %12 = vsyncpa [#allocation6], 0  ;;  %s621_s18 = smov [#allocation7]   ;;  %s622_s20 = smov [#allocation4]  }
   0x3   :  { %s34_s19 = sshll.u32 %s621_s18, 4  ;;  %s18_s21 = sshll.u32 %s622_s20, 4  ;;  %s35_s19 = int_to_ptr.vmem [resolvable:$true] %s34_s19  ;;  %s664_s21 = int_to_ptr.vmem [resolvable:$true] %s18_s21 }
   0x4   :  { %s527_s24 = scalar_lea.hbm %s726_s1, 1024 }
   0x5   :  { %p528_p0 = scmp.ne.s32.totalorder %s726_s1, %s527_s24  ;;  %p531_p1 = scmp.lt.u32.totalorder %s527_s24, %s726_s1 }
   0x7   :  { %p533_p2 = pnand %p531_p1, %p528_p0 }
   0x9   :  { %536 = shalt.err (!%p533_p2)
}
   0xa   :  { %s537_s29 = scalar_lea.vmem %s35_s19, 1024  ;;  %p542_p4 = scmp.lt.s32.totalorder %s35_s19, %s35_s19 }
   0xb   :  { %p538_p3 = scmp.ne.s32.totalorder %s35_s19, %s537_s29  ;;  %p543_p5 = scmp.lt.s32.totalorder %s537_s29, %s537_s29 }
   0xd   :  { %p544_p6 = por %p543_p5, %p542_p4 }
   0xf   :  { %p545_p7 = pnand %p544_p6, %p538_p3 }
  0x11   :  { %548 = shalt.err (!%p545_p7)
}
  0x12   :  { %s623_s30 = smov 64   ;;  %s624_s6 = smov 4  }
  0x13   :  { %40 = dma.hbm_to_vmem [thread:$0]  %s726_s1, 1024, %s35_s19, [#allocation8], %s623_s30, %s623_s30, %s624_s6  }
  0x14   :  { %s549_s11 = scalar_lea.hbm %s725_s0, 128 }
  0x15   :  { %p550_p8 = scmp.ne.s32.totalorder %s725_s0, %s549_s11  ;;  %p553_p9 = scmp.lt.u32.totalorder %s549_s11, %s725_s0 }
  0x17   :  { %p555_p10 = pnand %p553_p9, %p550_p8 }
  0x19   :  { %558 = shalt.err (!%p555_p10)
}
  0x1a   :  { %s559_s16 = scalar_lea.vmem %s664_s21, 128  ;;  %p564_p12 = scmp.lt.s32.totalorder %s664_s21, %s664_s21 }
  0x1b   :  { %p560_p11 = scmp.ne.s32.totalorder %s664_s21, %s559_s16  ;;  %p565_p13 = scmp.lt.s32.totalorder %s559_s16, %s559_s16 }
  0x1d   :  { %p566_p0 = por %p565_p13, %p564_p12 }
  0x1f   :  { %p567_p1 = pnand %p566_p0, %p560_p11 }
  0x21   :  { %570 = shalt.err (!%p567_p1)
}
  0x22   :  { %24 = dma.hbm_to_vmem [thread:$0]  %s725_s0, 128, %s664_s21, [#allocation5], %s623_s30, %s623_s30, %s624_s6  }
  0x23   :  { %s625_s18 = smov [#allocation9]   ;;  %s571_s23 = scalar_lea.hbm %s728_s3, 2048 }
  0x24   :  { %s55_s19 = sshll.u32 %s625_s18, 4  ;;  %p572_p2 = scmp.ne.s32.totalorder %s728_s3, %s571_s23  ;;  %s56_s19 = int_to_ptr.vmem [resolvable:$true] %s55_s19 }
  0x25   :  { %p575_p3 = scmp.lt.u32.totalorder %s571_s23, %s728_s3 }
  0x27   :  { %p577_p4 = pnand %p575_p3, %p572_p2 }
  0x29   :  { %580 = shalt.err (!%p577_p4)
}
  0x2a   :  { %s581_s28 = scalar_lea.vmem %s56_s19, 2048  ;;  %p586_p6 = scmp.lt.s32.totalorder %s56_s19, %s56_s19 }
  0x2b   :  { %p582_p5 = scmp.ne.s32.totalorder %s56_s19, %s581_s28  ;;  %p587_p7 = scmp.lt.s32.totalorder %s581_s28, %s581_s28 }
  0x2d   :  { %p588_p8 = por %p587_p7, %p586_p6 }
  0x2f   :  { %p589_p9 = pnand %p588_p8, %p582_p5 }
  0x31   :  { %592 = shalt.err (!%p589_p9)
}
  0x32   :  { %s626_s0 = smov 128   ;;  %s627_s21 = smov 8  }
  0x33   :  { %61 = dma.hbm_to_vmem [thread:$0]  %s728_s3, 2048, %s56_s19, [#allocation8], %s626_s0, %s626_s0, %s627_s21  }
  0x34   :  { %615 = dma.done.wait [#allocation5], 128  }
  0x35   :  { %616 = vsyncadd [#allocation5], 4294967168 }
  0x36   :  { %617 = dma.done.wait [#allocation8], 3072  }
  0x37   :  { %618 = vsyncadd [#allocation8], 4294964224  ;;  %v628_v0 = vmov 0.0   ;;  %vm629_vm0 = vmmov 0   ;;  %v494_v1 = vld [vmem:[#allocation7] sm:$0xff]   ;;  %v495_v2 = vld [vmem:[#allocation7 + $0x8] sm:$0xff]   ;;  %v385_v37 = vlaneseq }
  0x38   :  { %461 = vmatprep.subr.bf16.mxu0 %v628_v0  ;;  %477 = vmatprep.mubr.msk.bf16.mxu0 %vm629_vm0, %v628_v0  ;;  %v496_v3 = vld [vmem:[#allocation7 + $0x10] sm:$0xff]   ;;  %v497_v4 = vld [vmem:[#allocation7 + $0x18] sm:$0xff]   ;;  %v503_v5 = vld [vmem:[#allocation9 + $0x4] ss:$8 sps:$4 sm:$0xff]   ;;  %v630_v26 = vmov 0  }
  0x39   :  { %462 = vmatpush3.bf16.msra.mxu0 %v494_v1  ;;  %v505_v6 = vld [vmem:[#allocation9] ss:$8 sps:$4 sm:$0xff]   ;;  %325 = vmatprep.subr.bf16.mxu1 %v503_v5  ;;  %v506_v7 = vld [vmem:[#allocation9 + $0x14] ss:$8 sps:$4 sm:$0xff]   ;;  %v508_v8 = vld [vmem:[#allocation9 + $0x10] ss:$8 sps:$4 sm:$0xff]  }
  0x3a   :  { %463 = vmatprep.subr.bf16.mxu0 %v628_v0  ;;  %326 = vmatpush1.bf16.msra.mxu1 %v505_v6  ;;  %v509_v9 = vld [vmem:[#allocation9 + $0x24] ss:$8 sps:$4 sm:$0xff]   ;;  %v511_v11 = vld [vmem:[#allocation9 + $0x20] ss:$8 sps:$4 sm:$0xff]   ;;  %v512_v12 = vld [vmem:[#allocation9 + $0x34] ss:$8 sps:$4 sm:$0xff]  }
  0x3b   :  { %327 = vmatprep.subr.bf16.mxu1 %v506_v7  ;;  %v498_v10 = vld [vmem:[#allocation7 + $0x20] sm:$0xff]   ;;  %v499_v13 = vld [vmem:[#allocation7 + $0x28] sm:$0xff]   ;;  %v514_v14 = vld [vmem:[#allocation9 + $0x30] ss:$8 sps:$4 sm:$0xff]   ;;  %357 = vmatprep.mubr.bf16.mxu1 %v630_v26  ;;  %v386_v38 = vshrl.u32 %v385_v37, 7 }
  0x3c   :  { %v515_v15 = vld [vmem:[#allocation9 + $0x44] ss:$8 sps:$4 sm:$0xff]   ;;  %v500_v16 = vld [vmem:[#allocation7 + $0x30] sm:$0xff]   ;;  %v517_v17 = vld [vmem:[#allocation9 + $0x40] ss:$8 sps:$4 sm:$0xff]  }
  0x3d   :  { %464 = vmatpush3.bf16.msra.mxu0 %v495_v2  ;;  %v518_v18 = vld [vmem:[#allocation9 + $0x54] ss:$8 sps:$4 sm:$0xff]   ;;  %v520_v20 = vld [vmem:[#allocation9 + $0x50] ss:$8 sps:$4 sm:$0xff]   ;;  %v521_v22 = vld [vmem:[#allocation9 + $0x64] ss:$8 sps:$4 sm:$0xff]  }
  0x3e   :  { %465 = vmatprep.subr.bf16.mxu0 %v628_v0  ;;  %328 = vmatpush1.bf16.msra.mxu1 %v508_v8  ;;  %v501_v19 = vld [vmem:[#allocation7 + $0x38] sm:$0xff]   ;;  %v523_v23 = vld [vmem:[#allocation9 + $0x60] ss:$8 sps:$4 sm:$0xff]   ;;  %v387_v39 = vsub.s32 0, %v386_v38  ;;  %v391_v41 = vsub.s32 1, %v386_v38 }
  0x3f   :  { %329 = vmatprep.subr.bf16.mxu1 %v509_v9  ;;  %v502_v21 = vld [vmem:[#allocation4] sm:$0xff]  }
  0x40   :  { %v524_v24 = vld [vmem:[#allocation9 + $0x74] ss:$8 sps:$4 sm:$0xff]   ;;  %v526_v25 = vld [vmem:[#allocation9 + $0x70] ss:$8 sps:$4 sm:$0xff]  }
  0x41   :  { %466 = vmatpush3.bf16.msra.mxu0 %v496_v3  ;;  %v426_v27 = vld [vmem:[%s727_s2] ss:$0 sm:$0xff]  ;;  %s631_s2 = smov [#allocation10]  }
  0x42   :  { %467 = vmatprep.subr.bf16.mxu0 %v628_v0  ;;  %330 = vmatpush1.bf16.msra.mxu1 %v511_v11  ;;  %v383_v40 = vld [vmem:[%s729_s4] sm:$0x3]  ;;  %s408_s9 = sshll.u32 %s631_s2, 4  ;;  %s409_s9 = int_to_ptr.vmem [resolvable:$true] %s408_s9 }
  0x43   :  { %331 = vmatprep.subr.bf16.mxu1 %v512_v12  ;;  %v388_v42 = vrot.slane %v383_v40, %v387_v39  ;;  %v392_v43 = vrot.slane %v383_v40, %v391_v41  ;;  %s593_s10 = scalar_lea.vmem %s409_s9, 512  ;;  %p598_p11 = scmp.lt.s32.totalorder %s409_s9, %s409_s9 }
  0x44   :  { %p594_p10 = scmp.ne.s32.totalorder %s409_s9, %s593_s10  ;;  %p599_p12 = scmp.lt.s32.totalorder %s593_s10, %s593_s10 }
  0x45   :  { %468 = vmatpush3.bf16.msra.mxu0 %v497_v4 }
  0x46   :  { %469 = vmatprep.subr.bf16.mxu0 %v628_v0  ;;  %332 = vmatpush1.bf16.msra.mxu1 %v514_v14  ;;  %p600_p13 = por %p599_p12, %p598_p11 }
  0x47   :  { %333 = vmatprep.subr.bf16.mxu1 %v515_v15 }
  0x48   :  { %p601_p0 = pnand %p600_p13, %p594_p10 }
  0x49   :  { %470 = vmatpush3.bf16.msra.mxu0 %v498_v10 }
  0x4a   :  { %471 = vmatprep.subr.bf16.mxu0 %v628_v0  ;;  %334 = vmatpush1.bf16.msra.mxu1 %v517_v17 }
  0x4b   :  { %335 = vmatprep.subr.bf16.mxu1 %v518_v18 }
  0x4d   :  { %472 = vmatpush3.bf16.msra.mxu0 %v499_v13 }
  0x4e   :  { %473 = vmatprep.subr.bf16.mxu0 %v628_v0  ;;  %336 = vmatpush1.bf16.msra.mxu1 %v520_v20 }
  0x4f   :  { %337 = vmatprep.subr.bf16.mxu1 %v521_v22 }
  0x51   :  { %474 = vmatpush3.bf16.msra.mxu0 %v500_v16 }
  0x52   :  { %475 = vmatprep.subr.bf16.mxu0 %v628_v0  ;;  %338 = vmatpush1.bf16.msra.mxu1 %v523_v23 }
  0x53   :  { %339 = vmatprep.subr.bf16.mxu1 %v524_v24 }
  0x55   :  { %476 = vmatpush3.bf16.msra.mxu0 %v501_v19 }
  0x56   :  { %340 = vmatpush1.bf16.msra.mxu1 %v526_v25 }
  0x58   :  { %478 = vmatmul.mubr.bf16.vlgmr.msra.gmra.mrb[0].mxu0 %v502_v21 }
 0x12b   :  { %v213_v28 = vpop.f32.mrb[0].mxu0 }
 0x12c   :  { %v214_v29 = vadd.f32 %v426_v27, %v213_v28  ;;  %v479_v30 = vpop.f32.mrb[1].mxu0 }
 0x12d   :  { %v216_v31 = vpop.f32.mrb[2].mxu0 }
 0x12e   :  { %v217_v32 = vadd.f32 %v426_v27, %v216_v31  ;;  %v480_v33 = vpop.f32.mrb[3].mxu0  ;;  %v220_v34 = vmax.f32 %v214_v29, 0.0 }
 0x130   :  { %v221_v35 = vmax.f32 %v217_v32, 0.0 }
 0x132   :  { %v222_v36 = vpack.c.bf16 %v221_v35, %v220_v34 }
 0x134   :  { %358 = vmatmul.mubr.bf16.vlgmr.msra.gmra.mrb[0].mxu1 %v222_v36 }
 0x207   :  { %v359_v44 = vpop.f32.mrb[0].mxu1 }
 0x208   :  { %v395_v45 = vadd.f32 %v388_v42, %v359_v44  ;;  %v361_v46 = vpop.f32.mrb[1].mxu1 }
 0x209   :  { %v396_v47 = vadd.f32 %v392_v43, %v361_v46  ;;  %v363_v48 = vpop.f32.mrb[2].mxu1 }
 0x20a   :  { %399 = vst [vmem:[#allocation10] sm:$0xff] %v395_v45  ;;  %v397_v49 = vadd.f32 %v388_v42, %v363_v48  ;;  %v365_v50 = vpop.f32.mrb[3].mxu1 }
 0x20b   :  { %400 = vst [vmem:[#allocation10 + $0x8] sm:$0xff] %v396_v47  ;;  %v398_v51 = vadd.f32 %v392_v43, %v365_v50 }
 0x20c   :  { %401 = vst [vmem:[#allocation10 + $0x10] sm:$0xff] %v397_v49 }
 0x20d   :  { %402 = vst [vmem:[#allocation10 + $0x18] sm:$0xff] %v398_v51 }
 0x20e   :  { %604 = shalt.err (!%p601_p0)
}
 0x20f   :  { %s605_s12 = scalar_lea.hbm %s730_s5, 512 }
 0x210   :  { %p606_p1 = scmp.ne.s32.totalorder %s730_s5, %s605_s12  ;;  %p609_p2 = scmp.lt.u32.totalorder %s605_s12, %s730_s5 }
 0x212   :  { %p611_p3 = pnand %p609_p2, %p606_p1 }
 0x214   :  { %614 = shalt.err (!%p611_p3)
}
 0x215   :  { %s632_s1 = smov 256   ;;  %s633_s17 = smov 16  }
 0x216   :  { %414 = dma.vmem_to_hbm [thread:$0]  %s409_s9, 512, %s730_s5, [#allocation6], %s632_s1, %s632_s1, %s633_s17  }
 0x217   :  { %619 = dma.done.wait [#allocation6], 512  }
 0x218   :  { %620 = vsyncadd [#allocation6], 4294966784 }
 0x219   :  { %418 = vsyncpa [#allocation5], 1 }
 0x21a   :  { %419 = vsyncpa [#allocation8], 1 }
 0x21b   :  { %420 = vsyncpa [#allocation6], 1 }

</bundles_post_ra>
